<compile_context>
chip_gen: v6e
topology: v6e:2x2x1
jax: 0.10.0
libtpu: 0.0.40
codegen_flags: <defaults>
</compile_context>

<pallas_src>
import functools

import jax
import jax.numpy as jnp
from jax import lax
from jax.experimental import pallas as pl
from jax.experimental.pallas import tpu as pltpu

# Scoped-VMEM budget: <= 48 MiB is safe on v7x (64 MiB physical) and leaves
# plenty of headroom on v5e/v6e (128 MiB physical).
_VMEM_LIMIT = 48 * 1024 * 1024


def _sublane_multiple(dtype):
    """Minimum second-to-last-dim tile multiple for a dtype (8 f32, 16 bf16)."""
    return max(8, 32 // jnp.dtype(dtype).itemsize)


def _pick_tile(n, target, multiple):
    """Largest divisor of n that is <= target and a multiple of `multiple`.

    Falls back to the full extent (always a legal BlockSpec size) when no
    aligned divisor exists (e.g. non-aligned shapes like L=197).
    """
    t = min(n, target)
    t -= t % multiple
    while t >= multiple:
        if n % t == 0:
            return t
        t -= multiple
    return n


# ---------------------------------------------------------------------------
# Tiled matmul kernels
# ---------------------------------------------------------------------------
def _matmul_kernel_acc(x_ref, w_ref, o_ref, acc_ref):
    @pl.when(pl.program_id(2) == 0)
    def _():
        acc_ref[...] = jnp.zeros(acc_ref.shape, acc_ref.dtype)

    acc_ref[...] += jnp.dot(x_ref[...], w_ref[...],
                            preferred_element_type=jnp.float32)

    @pl.when(pl.program_id(2) == pl.num_programs(2) - 1)
    def _():
        o_ref[...] = acc_ref[...].astype(o_ref.dtype)


def _matmul_bias_kernel_acc(x_ref, w_ref, b_ref, o_ref, acc_ref):
    @pl.when(pl.program_id(2) == 0)
    def _():
        acc_ref[...] = jnp.zeros(acc_ref.shape, acc_ref.dtype)

    acc_ref[...] += jnp.dot(x_ref[...], w_ref[...],
                            preferred_element_type=jnp.float32)

    @pl.when(pl.program_id(2) == pl.num_programs(2) - 1)
    def _():
        o_ref[...] = (acc_ref[...] + b_ref[...].astype(jnp.float32)
                      ).astype(o_ref.dtype)


def _matmul_kernel_1k(x_ref, w_ref, o_ref):
    # Single K step: no accumulator round trip through VMEM.
    o_ref[...] = jnp.dot(x_ref[...], w_ref[...],
                         preferred_element_type=jnp.float32).astype(o_ref.dtype)


def _matmul_bias_kernel_1k(x_ref, w_ref, b_ref, o_ref):
    acc = jnp.dot(x_ref[...], w_ref[...], preferred_element_type=jnp.float32)
    o_ref[...] = (acc + b_ref[...].astype(jnp.float32)).astype(o_ref.dtype)


def pallas_linear(x, w_t, b=None, *, tm=256, tn=512, tk=512):
    """x: (B, L, Din) @ w_t: (Din, Dout) [+ b: (Dout,)] -> (B, L, Dout)."""
    B, L, Din = x.shape
    Dout = w_t.shape[1]
    M = B * L
    x2 = x.reshape(M, Din)                       # contiguous reshape, free

    sub = _sublane_multiple(x.dtype)
    tm = _pick_tile(M, tm, sub)
    tn = _pick_tile(Dout, tn, 128)
    tk = _pick_tile(Din, tk, 128)
    gk = pl.cdiv(Din, tk)

    out_shape = jax.ShapeDtypeStruct((M, Dout), x.dtype)
    args = (x2, w_t) if b is None else (x2, w_t, b.reshape(1, Dout))

    if gk == 1:
        # Fast path: one K step -> write the MXU result straight to the output
        # tile, 2-D all-parallel grid, no scratch.
        grid = (M // tm, Dout // tn)
        in_specs = [pl.BlockSpec((tm, tk), lambda i, j: (i, 0)),
                    pl.BlockSpec((tk, tn), lambda i, j: (0, j))]
        if b is not None:
            in_specs.append(pl.BlockSpec((1, tn), lambda i, j: (0, j)))
        out2 = pl.pallas_call(
            _matmul_kernel_1k if b is None else _matmul_bias_kernel_1k,
            out_shape=out_shape,
            grid=grid,
            in_specs=in_specs,
            out_specs=pl.BlockSpec((tm, tn), lambda i, j: (i, j)),
            compiler_params=pltpu.CompilerParams(
                dimension_semantics=("parallel", "parallel"),
                vmem_limit_bytes=_VMEM_LIMIT),
        )(*args)
    else:
        grid = (M // tm, Dout // tn, gk)
        in_specs = [pl.BlockSpec((tm, tk), lambda i, j, k: (i, k)),
                    pl.BlockSpec((tk, tn), lambda i, j, k: (k, j))]
        if b is not None:
            in_specs.append(pl.BlockSpec((1, tn), lambda i, j, k: (0, j)))
        out2 = pl.pallas_call(
            _matmul_kernel_acc if b is None else _matmul_bias_kernel_acc,
            out_shape=out_shape,
            grid=grid,
            in_specs=in_specs,
            out_specs=pl.BlockSpec((tm, tn), lambda i, j, k: (i, j)),
            scratch_shapes=[pltpu.VMEM((tm, tn), jnp.float32)],
            compiler_params=pltpu.CompilerParams(
                dimension_semantics=("parallel", "parallel", "arbitrary"),
                vmem_limit_bytes=_VMEM_LIMIT),
        )(*args)
    return out2.reshape(B, L, Dout)


# ---------------------------------------------------------------------------
# Flash-style attention core, reading q/k/v directly from the fused qkv buffer
# ---------------------------------------------------------------------------
def _flash_attn_kernel(q_ref, k_ref, v_ref, o_ref, m_sc, l_sc, acc_sc, *,
                       dh, hpb):
    # q_ref: (tq, bw)   k_ref / v_ref: (tkv, bw)   o_ref: (tq, bw)
    #   bw = hpb * dh (128 lanes); softmax scale is pre-folded into W_q.
    # scratch: m_sc / l_sc (hpb, tq, 1) f32; acc_sc (tq, bw) f32 (lane-dense).
    ki = pl.program_id(3)

    @pl.when(ki == 0)
    def _():
        m_sc[...] = jnp.full(m_sc.shape, -jnp.inf, m_sc.dtype)
        l_sc[...] = jnp.zeros(l_sc.shape, l_sc.dtype)
        acc_sc[...] = jnp.zeros(acc_sc.shape, acc_sc.dtype)

    q = q_ref[...]
    k = k_ref[...]
    v = v_ref[...]
    tq, bw = q.shape
    lane = lax.broadcasted_iota(jnp.int32, (tq, bw), 1)

    # Per packed head: scores + online-softmax stats (the 64-deep QK^T
    # contraction is inherent to dh=64).  P@V is computed against the full
    # 128-lane V block (same MXU pass count as a 64-wide N) and per-head
    # results / rescales are merged with a lane-mask select so the accumulator
    # update and the epilogue are single full-width (tq, bw) ops — no 64-lane
    # slice stores and no lane-concatenate relayouts.
    pv_full = None
    alpha_full = None
    for p in range(hpb):
        qp = q[:, p * dh:(p + 1) * dh]
        kp = k[:, p * dh:(p + 1) * dh]
        s = lax.dot_general(qp, kp, (((1,), (1,)), ((), ())),
                            preferred_element_type=jnp.float32)      # (tq, tkv)

        m_prev = m_sc[p]                                             # (tq, 1)
        m_new = jnp.maximum(m_prev, jnp.max(s, axis=-1, keepdims=True))
        alpha = jnp.exp(m_prev - m_new)
        pm = jnp.exp(s - m_new)                                      # (tq, tkv)
        l_sc[p] = alpha * l_sc[p] + jnp.sum(pm, axis=-1, keepdims=True)
        m_sc[p] = m_new

        pv = jnp.dot(pm.astype(v.dtype), v,
                     preferred_element_type=jnp.float32)             # (tq, bw)
        alpha_b = jnp.broadcast_to(alpha, (tq, bw))
        if p == 0:
            pv_full, alpha_full = pv, alpha_b
        else:
            in_head = (lane >= p * dh) & (lane < (p + 1) * dh)
            pv_full = jnp.where(in_head, pv, pv_full)
            alpha_full = jnp.where(in_head, alpha_b, alpha_full)

    acc_sc[...] = alpha_full * acc_sc[...] + pv_full                 # full width

    @pl.when(ki == pl.num_programs(3) - 1)
    def _():
        inv_full = None
        for p in range(hpb):
            inv_b = jnp.broadcast_to(pl.reciprocal(l_sc[p], approx=True),
                                     (tq, bw))                       # EUP slot
            if p == 0:
                inv_full = inv_b
            else:
                in_head = (lane >= p * dh) & (lane < (p + 1) * dh)
                inv_full = jnp.where(in_head, inv_b, inv_full)
        o_ref[...] = (acc_sc[...] * inv_full).astype(o_ref.dtype)    # one store


def _default_attn_tiles():
    """tq=256 everywhere; tkv=128 on v5x (128-wide MXU), 256 on v6e/v7x."""
    try:
        kind = jax.devices()[0].device_kind.lower()
    except Exception:  # pragma: no cover
        kind = ""
    tkv = 128 if "v5" in kind else 256
    return 256, tkv


def flash_attention(qkv, num_heads, dim_per_head, *, tq=None, tkv=None):
    """qkv: (B, L, 3*H*Dh) fused projection -> z: (B, L, H*Dh).

    q/k/v are read straight out of the fused projection buffer via BlockSpec
    index maps and z is written already laid out as (B, L, H*Dh) — no HBM
    transposes.  The softmax scale must be pre-folded into the Q weights.
    """
    B, L, C = qkv.shape
    H, Dh = num_heads, dim_per_head
    inner = H * Dh
    assert C == 3 * inner

    # Pack heads so every block is a multiple of 128 lanes (lane-dense I/O).
    hpb = 1
    if Dh < 128 and 128 % Dh == 0 and H % (128 // Dh) == 0:
        hpb = 128 // Dh
    bw = hpb * Dh
    # TODO(synk): support head widths that don't pack to 128 lanes (Dh=80/96…)
    # via a JAX-side per-head fallback instead of asserting.
    assert bw % 128 == 0, "head block width must be a multiple of 128 lanes"
    assert inner % bw == 0
    HG = H // hpb

    d_tq, d_tkv = _default_attn_tiles()
    sub = _sublane_multiple(qkv.dtype)
    tq = _pick_tile(L, d_tq if tq is None else tq, sub)
    tkv = _pick_tile(L, d_tkv if tkv is None else tkv, 128)

    # Leading parallel axes (B, HG, q-tiles) feed both v7x TensorCores as long
    # as B*HG*(L//tq) >= 2; the kv axis is the innermost reduction.
    grid = (B, HG, L // tq, L // tkv)

    kk_off = inner // bw       # column-block offset of the K section
    kv_off = 2 * inner // bw   # column-block offset of the V section

    q_spec = pl.BlockSpec((pl.Squeezed(), tq, bw),
                          lambda b, hg, qi, ki: (b, qi, hg))
    k_spec = pl.BlockSpec((pl.Squeezed(), tkv, bw),
                          lambda b, hg, qi, ki: (b, ki, hg + kk_off))
    v_spec = pl.BlockSpec((pl.Squeezed(), tkv, bw),
                          lambda b, hg, qi, ki: (b, ki, hg + kv_off))
    o_spec = pl.BlockSpec((pl.Squeezed(), tq, bw),
                          lambda b, hg, qi, ki: (b, qi, hg))

    kernel = functools.partial(_flash_attn_kernel, dh=Dh, hpb=hpb)
    return pl.pallas_call(
        kernel,
        out_shape=jax.ShapeDtypeStruct((B, L, inner), qkv.dtype),
        grid=grid,
        in_specs=[q_spec, k_spec, v_spec],
        out_specs=o_spec,
        scratch_shapes=[
            pltpu.VMEM((hpb, tq, 1), jnp.float32),   # running max
            pltpu.VMEM((hpb, tq, 1), jnp.float32),   # running denominator
            pltpu.VMEM((tq, bw), jnp.float32),       # running numerator
        ],
        compiler_params=pltpu.CompilerParams(
            dimension_semantics=("parallel", "parallel", "parallel", "arbitrary"),
            vmem_limit_bytes=_VMEM_LIMIT),
    )(qkv, qkv, qkv)


# ---------------------------------------------------------------------------
# SelfAttention module (forward pass)
# ---------------------------------------------------------------------------
class SelfAttentionPallas:
    def __init__(self, dim, num_heads=8, dim_per_head=64, dropout=0.0, *,
                 key, dtype=jnp.float32):
        self.num_heads = num_heads
        self.dim_per_head = dim_per_head
        self.scale = dim_per_head ** (-0.5)
        inner_dim = dim_per_head * num_heads
        self.inner_dim = inner_dim
        self.project_out = not (num_heads == 1 and dim_per_head == dim)

        k1, k2, k3 = jax.random.split(key, 3)
        # PyTorch nn.Linear stores W as (out_features, in_features); kept fp32
        # for the reference check.
        self.w_qkv = jax.random.normal(k1, (inner_dim * 3, dim), jnp.float32) * 0.02
        # Pre-transpose once at init (kernels consume (in, out)) and fold the
        # softmax scale into the Q columns so the attention kernel never
        # multiplies by it.
        w_qkv_t = self.w_qkv.T
        w_qkv_t = w_qkv_t.at[:, :inner_dim].multiply(self.scale)
        self.w_qkv_t = w_qkv_t.astype(dtype)
        if self.project_out:
            self.w_out = jax.random.normal(k2, (dim, inner_dim), jnp.float32) * 0.02
            self.b_out = jax.random.normal(k3, (dim,), jnp.float32) * 0.02  # fp32
            self.w_out_t = self.w_out.T.astype(dtype)
        else:
            self.w_out = self.b_out = self.w_out_t = None
        # nn.Dropout(p=0.0) is an identity at inference; nothing to emit.

    def __call__(self, x):
        # i. fused QKV projection (tiled Pallas matmul; scale pre-folded)
        qkv = pallas_linear(x, self.w_qkv_t)                    # (B, L, 3*H*Dh)
        # ii + iii. flash attention directly on the fused buffer; writes z
        # already laid out as (B, L, H*Dh) — no JAX transposes.
        z = flash_attention(qkv, self.num_heads, self.dim_per_head)
        # iv. output projection (+bias) or identity
        if self.project_out:
            return pallas_linear(z, self.w_out_t, self.b_out)
        return z


# ---------------------------------------------------------------------------
# Reference (plain JAX) for a sanity check
# ---------------------------------------------------------------------------
def reference_forward(mod: SelfAttentionPallas, x):
    b, l, d = x.shape
    H, Dh = mod.num_heads, mod.dim_per_head
    qkv = x @ mod.w_qkv.T                       # unscaled weights here
    qkv = qkv.reshape(b, l, 3, H, Dh).transpose(2, 0, 3, 1, 4)
    q, k, v = qkv[0], qkv[1], qkv[2]
    s = jnp.einsum("bhld,bhmd->bhlm", q, k) * mod.scale
    p = jax.nn.softmax(s, axis=-1)
    z = jnp.einsum("bhlm,bhmd->bhld", p, v)
    z = z.transpose(0, 2, 1, 3).reshape(b, l, H * Dh)
    if mod.project_out:
        return z @ mod.w_out.T + mod.b_out
    return z


if __name__ == "__main__":
    key = jax.random.PRNGKey(0)
    k_x, k_p, k_t = jax.random.split(key, 3)

    # Small but tile-aligned: 2 q-tiles and >=2 kv steps per (batch, head-group)
    # at the default tq=256 (online-softmax accumulation exercised) plus a
    # multi-block N axis on the QKV projection.
    B, L, D = 2, 512, 128
    NUM_HEADS, DIM_PER_HEAD = 8, 64

    x = jax.random.normal(k_x, (B, L, D), jnp.float32)
    mod = SelfAttentionPallas(D, num_heads=NUM_HEADS, dim_per_head=DIM_PER_HEAD,
                              key=k_p)

    out = jax.block_until_ready(mod(x))
    ref = reference_forward(mod, x)
    assert out.shape == (B, L, D), out.shape
    # tolerance covers the EUP approx-reciprocal softmax denominator
    assert jnp.allclose(out, ref, atol=2e-3, rtol=2e-3), float(
        jnp.max(jnp.abs(out - ref)))

    # Exercise the multi-K-step fp32-accumulator matmul path explicitly (both
    # module projections hit the single-K-step fast path at D=128).
    t = jax.random.normal(k_t, (B, L, mod.inner_dim), jnp.float32)
    y = jax.block_until_ready(pallas_linear(t, mod.w_out_t, mod.b_out, tk=128))
    y_ref = jnp.einsum("blk,kd->bld", t, mod.w_out_t) + mod.b_out
    assert jnp.allclose(y, y_ref, atol=1e-4, rtol=1e-4), float(
        jnp.max(jnp.abs(y - y_ref)))

    # bf16 smoke run (halves HBM traffic, full-rate bf16 MXU); fp32
    # accumulators and fp32 softmax stats are kept inside the kernels.
    mod_bf16 = SelfAttentionPallas(D, num_heads=NUM_HEADS,
                                   dim_per_head=DIM_PER_HEAD, key=k_p,
                                   dtype=jnp.bfloat16)
    out_bf16 = jax.block_until_ready(mod_bf16(x.astype(jnp.bfloat16)))
    assert out_bf16.shape == (B, L, D)
    out_bf16_f32 = out_bf16.astype(jnp.float32)
    assert bool(jnp.all(jnp.isfinite(out_bf16_f32)))
    assert jnp.allclose(out_bf16_f32, ref, atol=3e-2, rtol=3e-2), float(
        jnp.max(jnp.abs(out_bf16_f32 - ref)))

    print("KERNEL_OK")
</pallas_src>

<mosaic_0001>
module attributes {stable_mosaic.version = 11 : i64} {
  func.func @_matmul_kernel_1k(%arg0: i32, %arg1: i32, %arg2: memref<256x128xf32, #tpu.memory_space<vmem>>, %arg3: memref<128x512xf32, #tpu.memory_space<vmem>>, %arg4: memref<256x512xf32, #tpu.memory_space<vmem>>) attributes {dimension_semantics = [#tpu.dimension_semantics<parallel>, #tpu.dimension_semantics<parallel>], iteration_bounds = array<i64: 4, 3>, scalar_prefetch = 0 : i64, scratch_operands = 0 : i64, tpu.core_type = #tpu.core_type<tc>, window_params = [{transform_indices = @transform_0, window_bounds = array<i64: 256, 128>}, {transform_indices = @transform_1, window_bounds = array<i64: 128, 512>}, {transform_indices = @transform_2, window_bounds = array<i64: 256, 512>}]} {
    %c0 = arith.constant 0 : index
    %c0_0 = arith.constant 0 : index
    %0 = vector.load %arg2[%c0, %c0_0] : memref<256x128xf32, #tpu.memory_space<vmem>>, vector<256x128xf32>
    %c0_1 = arith.constant 0 : index
    %c0_2 = arith.constant 0 : index
    %1 = vector.load %arg3[%c0_1, %c0_2] : memref<128x512xf32, #tpu.memory_space<vmem>>, vector<128x512xf32>
    %cst = arith.constant dense<0.000000e+00> : vector<256x512xf32>
    %2 = tpu.matmul %0, %1, %cst {dimension_numbers = #tpu.dot_dimension_numbers<[1], [0], [0], [1], [0, 0, 1, 1], [], []>} : vector<256x128xf32>, vector<128x512xf32>, vector<256x512xf32> -> vector<256x512xf32>
    %c0_3 = arith.constant 0 : index
    %c0_4 = arith.constant 0 : index
    %3 = vector.load %arg4[%c0_3, %c0_4] : memref<256x512xf32, #tpu.memory_space<vmem>>, vector<256x512xf32>
    tpu.vector_store %arg4[%c0_3, %c0_4], %2 {strides = array<i32>} : memref<256x512xf32, #tpu.memory_space<vmem>>, vector<256x512xf32>,
    return
  }
  func.func @transform_0(%arg0: i32, %arg1: i32) -> (i32, i32) {
    %c0_i32 = arith.constant 0 : i32
    %c0_i32_0 = arith.constant 0 : i32
    return %arg0, %c0_i32 : i32, i32
  }
  func.func @transform_1(%arg0: i32, %arg1: i32) -> (i32, i32) {
    %c0_i32 = arith.constant 0 : i32
    %c0_i32_0 = arith.constant 0 : i32
    return %c0_i32, %arg1 : i32, i32
  }
  func.func @transform_2(%arg0: i32, %arg1: i32) -> (i32, i32) {
    %c0_i32 = arith.constant 0 : i32
    return %arg0, %arg1 : i32, i32
  }
}

</mosaic_0001>

<bundles_post_ra>
// kernel: tpu_custom_call.1
= control target key start
LH: loop header
LB: loop body
LE: loop exit
PB: predicated region body
PF: predicated region fallthrough
CT: control target
= control target key end

     0   :  { %s2064_s0 = inlined_call_operand.hbm [shape: f32[1024,128], index: 0, kind: input, shape index: {}]   ;;  %s2065_s1 = inlined_call_operand.hbm [shape: f32[128,1536], index: 1, kind: input, shape index: {}]   ;;  %s2066_s2 = inlined_call_operand.hbm [shape: f32[1024,1536], index: 2, kind: output, shape index: {}]  }
   0x1   :  { %2074 = sst [smem:[#allocation17_spill]] %s2064_s0 }
   0x2   :  { %2075 = sst [smem:[#allocation18_spill]] %s2066_s2 }
   0x3   :  { %7 = vsyncpa [#allocation3], 0 }
   0x4   :  { %9 = vsyncpa [#allocation3 + $0x1], 0 }
   0x5   :  { %10 = vsyncpa [#allocation6], 0 }
   0x6   :  { %12 = vsyncpa [#allocation6 + $0x1], 0 }
   0x7   :  { %13 = vsyncpa [#allocation4], 0 }
   0x8   :  { %15 = vsyncpa [#allocation4 + $0x1], 0  ;;  %s1482_s9 = smov 0   ;;  %s1484_s10 = smov 0  }
   0x9   :  { %s1486_s11 = smov 0   ;;  %s1488_s12 = smov 0  }
   0xa   :  { %s1490_s13 = smov 0   ;;  %s1492_s14 = smov 0  }
   0xb   :  { %s1494_s15 = smov 0   ;;  %s1496_s16 = smov 0  }
   0xc   :  { %s1498_s17 = smov 0   ;;  %s1500_s18 = smov 0  }
   0xd   :  { %s1502_s19 = smov 0   ;;  %s1504_s20 = smov 0  }
   0xe   :  { %s1506_s21 = smov 0   ;;  %s1508_s22 = smov 0  }
   0xf LB: > { %2076 = sst [smem:[#allocation11_spill]] %s1437_s18  ;;  %s1085_s23 = sadd.s32 4294967295, %s1453_s22   ;;  %s1453_s22 = sphi %s1508_s22, %s21_s22   ;;  %s1449_s21 = sphi %s1506_s21, %s2104_s21   ;;  %s1445_s20 = sphi %s1504_s20, %s2115_s20   ;;  %s1441_s19 = sphi %s1502_s19, %s2102_s19   ;;  %s1437_s18 = sphi %s1500_s18, %s2114_s18   ;;  %s1433_s17 = sphi %s1498_s17, %s2113_s17   ;;  %s1429_s16 = sphi %s1496_s16, %s2112_s16   ;;  %s1425_s15 = sphi %s1494_s15, %s2111_s15   ;;  %s1421_s14 = sphi %s1492_s14, %s2110_s14   ;;  %s1417_s13 = sphi %s1490_s13, %s2109_s13   ;;  %s1413_s12 = sphi %s1488_s12, %s2108_s12   ;;  %s1409_s11 = sphi %s1486_s11, %s2107_s11   ;;  %s1405_s10 = sphi %s1484_s10, %s2106_s10   ;;  %s1401_s9 = sphi %s1482_s9, %s2105_s9  }
  0x10   : > { %2077 = sst [smem:[#allocation12_spill]] %s1449_s21  ;;  %p47_p0 = scmp.ne.s32.totalorder %s1433_s17, %s1429_s16 }
  0x11   : > { %p48_p1 = scmp.eq.s32.totalorder %s1453_s22, 0  ;;  %p53_p2 = scmp.ne.s32.totalorder %s1429_s16, %s1425_s15 }
  0x12   : > { %p1557_p3 = scmp.eq.s32.totalorder %s1085_s23, 0  ;;  %p1561_p4 = scmp.eq.s32.totalorder %s1085_s23, 11 }
  0x13   : > { %p49_p5 = por %p48_p1, %p47_p0  ;;  %p1126_p7 = scmp.lt.s32.totalorder %s1453_s22, 12 }
  0x14   : > { %p1569_p6 = por %p1557_p3, %p53_p2  ;;  %s131_s29 = sand.u32 1, %s1433_s17  }
  0x15   : > { %s1106_s30 = sshll.u32 %s1449_s21, 12  ;;  %s1089_s3 = sshll.u32 %s131_s29, 8 }
  0x16   : > { %s2081_s0 = sld [smem:[#allocation17_spill]]  ;;  %s135_s7 = scalar_lea.vmem [#allocation2], %s1089_s3 }
  0x17   : > { %s142_s8 = sshll.u32 %s135_s7, 4  ;;  %p1581_p8 = pnand %p1126_p7, %p49_p5  ;;  %s143_s8 = int_to_ptr.vmem [resolvable:$true] %s142_s8 }
  0x18   : > { %s132_s23 = scalar_lea.sflag [#allocation3], %s131_s29  ;;  %s1262_s25 = scalar_lea.vmem %s143_s8, 4096 }
  0x19   : > { %p1251_p9 = pneg %p1581_p8  ;;  %p1263_p10 = scmp.ne.s32.totalorder %s143_s8, %s1262_s25 }
  0x1a   : > { %s1455_s24 = smov [#allocation2]  }
  0x1b   : > { %p1265_p11 = pnand %p1263_p10, %p1251_p9  ;;  %s1267_s2 = sshll.u32 %s1455_s24, 4  ;;  %s1268_s2 = int_to_ptr.vmem [resolvable:$false] %s1267_s2 }
  0x1c   : > { %s141_s6 = scalar_lea.hbm %s2081_s0, %s1106_s30  ;;  %s1269_s30 = scalar_lea.vmem %s1268_s2, 8192 }
  0x1d   : > { %p1266_p12 = pneg %p1265_p11  ;;  %p1270_p13 = scmp.lt.s32.totalorder %s143_s8, %s1268_s2 }
  0x1e   : > { %p1271_p0 = scmp.lt.s32.totalorder %s1269_s30, %s1262_s25 }
  0x20   : > { %p1272_p2 = por %p1271_p0, %p1270_p13 }
  0x22   : > { %p1273_p5 = pnand %p1272_p2, %p1266_p12 }
  0x24   : > { %1276 = shalt.err (!%p1273_p5)
}
  0x25   : > { %s1456_s3 = smov 128   ;;  %s1457_s2 = smov 8  }
  0x26   : > { %1118 = dma.hbm_to_vmem [thread:$0]  (!%p1581_p8), %s141_s6, 4096, %s143_s8, %s132_s23, %s1456_s3, %s1456_s3, %s1457_s2  }
  0x27   : > { %p1095_p9 = scmp.ge.s32.totalorder %s1453_s22, 1  ;;  %p171_p10 = scmp.lt.s32.totalorder %s1453_s22, 13 }
  0x28   : > { %s1086_s25 = sadd.s32 4294967294, %s1453_s22   ;;  %s30_s29 = sadd.s32 1, %s1445_s20 }
  0x29   : > { %p1591_p11 = pnand %p1095_p9, %p171_p10  ;;  %s66_s4 = sadd.s32 1, %s1421_s14 }
  0x2a   : > { %p31_p12 = scmp.ge.s32.totalorder %s30_s29, 3  ;;  %p73_p13 = scmp.ne.s32.totalorder %s1421_s14, %s1417_s13 }
  0x2b   : > { %p79_p0 = scmp.ne.s32.totalorder %s1417_s13, %s1413_s12  ;;  %s94_s5 = sadd.s32 1, %s1409_s11 }
  0x2c   : > { %s2117_s29 = smov (%p31_p12, %s30_s29), 0  ;;  %s2085_s6 = sadd.s32 1, %s1449_s21 }
  0x2d   : > { %2084 = sst [smem:[#allocation13_spill]] %s2117_s29  ;;  %s2119_s6 = smov (!%p31_p12, %s2085_s6), %s1449_s21 }
  0x2e   : > { %s63_s7 = ssub.s32 %s1445_s20, %s2117_s29  ;;  %p1612_p8 = por %p73_p13, %p48_p1 }
  0x2f   : > { %p35_p2 = scmp.ge.s32.totalorder %s2119_s6, 4  ;;  %p64_p5 = scmp.eq.s32.totalorder %s63_s7, 0 }
  0x30   : > { %p1618_p9 = por %p79_p0, %p1557_p3  ;;  %p104_p10 = scmp.ne.s32.totalorder %s1409_s11, %s1405_s10 }
  0x31   : > { %s2121_s6 = smov (%p35_p2, %s2119_s6), 0  ;;  %p110_p13 = scmp.ne.s32.totalorder %s1405_s10, %s1401_s9 }
  0x32   : > { %2088 = sst [smem:[#allocation14_spill]] %s2121_s6  ;;  %s37_s23 = ssub.s32 %s1449_s21, %s2121_s6 }
  0x33   : > { %s1627_s15 = scalar_select %p64_p5, %s1421_s14, %s66_s4  }
  0x34   : > { %p1633_p1 = por %p1561_p4, %p104_p10  ;;  %p38_p12 = scmp.eq.s32.totalorder %s37_s23, 0 }
  0x35   : > { %2089 = sst [smem:[#allocation15_spill]] %s1627_s15  ;;  %s91_s26 = sor.u32 %s63_s7, %s37_s23 }
  0x36   : > { %s2090_s30 = scalar_select %p1633_p1, 1, 0 }
  0x37   : > { %p92_p3 = scmp.eq.s32.totalorder %s91_s26, 0  ;;  %s2092_s3 = sadd.s32 1, %s1433_s17 }
  0x38   : > { %2091 = sst [smem:[#allocation16_spill]] %s2090_s30  ;;  %p111_p0 = scmp.eq.s32.totalorder %s1086_s25, 11 }
  0x39   : > { %s1642_s2 = scalar_select %p38_p12, %s1433_s17, %s2092_s3  }
  0x3a   : > { %s1645_s0 = scalar_select %p92_p3, %s1409_s11, %s94_s5  }
  0x3b   : > { %s152_s4 = sand.u32 1, %s1421_s14   ;;  %p1648_p2 = por %p111_p0, %p110_p13 }
  0x3c   : > { %s1092_s29 = sshll.u32 %s152_s4, 9  ;;  %s1107_s6 = sshll.u32 %s1445_s20, 9 }
  0x3d   : > { %s2093_s27 = scalar_select %p1648_p2, 1, 0 }
  0x3e   : > { %s156_s21 = scalar_lea.vmem [#allocation5], %s1092_s29  ;;  %s162_s7 = scalar_lea.hbm %s2065_s1, %s1107_s6 }
  0x3f   : > { %s163_s15 = sshll.u32 %s156_s21, 4  ;;  %p1660_p4 = pnand %p1126_p7, %p1612_p8  ;;  %s164_s15 = int_to_ptr.vmem [resolvable:$true] %s163_s15 }
  0x40   : > { %s153_s25 = scalar_lea.sflag [#allocation6], %s152_s4  ;;  %s1290_s23 = scalar_lea.vmem %s164_s15, 8192 }
  0x41   : > { %p1279_p5 = pneg %p1660_p4  ;;  %p1291_p10 = scmp.ne.s32.totalorder %s164_s15, %s1290_s23 }
  0x42   : > { %s1458_s21 = smov [#allocation5]  }
  0x43   : > { %p1293_p12 = pnand %p1291_p10, %p1279_p5  ;;  %s1295_s29 = sshll.u32 %s1458_s21, 4  ;;  %s1296_s29 = int_to_ptr.vmem [resolvable:$false] %s1295_s29 }
  0x44   : > { %s1297_s18 = scalar_lea.vmem %s1296_s29, 16384  ;;  %p1298_p13 = scmp.lt.s32.totalorder %s164_s15, %s1296_s29 }
  0x45   : > { %p1294_p3 = pneg %p1293_p12  ;;  %p1299_p0 = scmp.lt.s32.totalorder %s1297_s18, %s1290_s23 }
  0x47   : > { %p1300_p2 = por %p1299_p0, %p1298_p13 }
  0x49   : > { %p1301_p1 = pnand %p1300_p2, %p1294_p3 }
  0x4b   : > { %1304 = shalt.err (!%p1301_p1)
}
  0x4c   : > { %s1459_s6 = smov 1536   ;;  %s1460_s8 = smov 512  }
  0x4d   : > { %s1461_s30 = smov 32   ;;  %175 = sbr.rel (%p1591_p11) target bundleno = 455 (0x1c7), region = 28 }
  0x4e   : > { %1121 = dma.hbm_to_vmem [thread:$0]  (!%p1660_p4), %s162_s7, 8192, %s164_s15, %s153_s25, %s1459_s6, %s1460_s8, %s1461_s30  }
  0x4f   : > { %s177_s26 = sand.u32 (!%p1591_p11), 1, %s1429_s16  }
  0x50   : > { %s1096_s3 = sshll.u32 (!%p1591_p11), %s177_s26, 8  ;;  %s178_s4 = scalar_lea.sflag (!%p1591_p11), [#allocation3], %s177_s26 }
  0x51   : > { %s1671_s21 = scalar_lea.vmem (!%p1591_p11), [#allocation2], %s1096_s3 }
  0x52   : > { %1388 = dma.done.wait (%p1569_p6), %s178_s4, 4096  }
  0x53   : > { %1390 = vsyncadd (%p1569_p6), %s178_s4, 4294963200  ;;  %s186_s23 = sand.u32 1, %s1417_s13  }
  0x54   : > { %s1097_s5 = sshll.u32 %s186_s23, 9  ;;  %s187_s15 = scalar_lea.sflag [#allocation6], %s186_s23 }
  0x55   : > { %s1678_s7 = scalar_lea.vmem [#allocation5], %s1097_s5 }
  0x56   : > { %1392 = dma.done.wait (%p1618_p9), %s187_s15, 8192  }
  0x57   : > { %1394 = vsyncadd (%p1618_p9), %s187_s15, 4294959104  ;;  %v1462_v0 = vmov 0.0   ;;  %v313_v1 = vld [vmem:[%s1678_s7 + $0x1e8] sm:$0xff]  ;;  %v315_v2 = vld [vmem:[%s1678_s7 + $0x1f8] sm:$0xff]  ;;  %s213_s28 = sand.u32 1, %s1405_s10   ;;  %s2095_s25 = sld [smem:[#allocation11_spill]] }
  0x58   : > { %380 = vmatprep.mubr.f32.mxu0 %v1462_v0  ;;  %637 = vmatprep.mubr.f32.mxu1 %v1462_v0  ;;  %v312_v3 = vld [vmem:[%s1678_s7 + $0x1e0] sm:$0xff]  ;;  %v314_v4 = vld [vmem:[%s1678_s7 + $0x1f0] sm:$0xff]  ;;  %v309_v5 = vld [vmem:[%s1678_s7 + $0x1c8] sm:$0xff]  ;;  %s1098_s24 = sshll.u32 %s213_s28, 10  ;;  %s1108_s29 = smul.u32 384, %s1441_s19 }
  0x59   : > { %316 = vmatprep.subr.mxu0 %v313_v1  ;;  %573 = vmatprep.subr.mxu1 %v315_v2  ;;  %v311_v6 = vld [vmem:[%s1678_s7 + $0x1d8] sm:$0xff]  ;;  %v308_v7 = vld [vmem:[%s1678_s7 + $0x1c0] sm:$0xff]  ;;  %v310_v8 = vld [vmem:[%s1678_s7 + $0x1d0] sm:$0xff]  ;;  %s1847_s12 = scalar_lea.vmem [#allocation7], %s1098_s24  ;;  %s2096_s30 = sld [smem:[#allocation16_spill]] }
  0x5a   : > { %317 = vmatpush1.msra.mxu0 %v312_v3  ;;  %574 = vmatpush1.msra.mxu1 %v314_v4  ;;  %v305_v9 = vld [vmem:[%s1678_s7 + $0x1a8] sm:$0xff]  ;;  %v307_v10 = vld [vmem:[%s1678_s7 + $0x1b8] sm:$0xff]  ;;  %v304_v11 = vld [vmem:[%s1678_s7 + $0x1a0] sm:$0xff]  ;;  %s975_s8 = sshll.u32 %s1847_s12, 4  ;;  %s2097_s4 = sld [smem:[#allocation18_spill]]  ;;  %s1981_s8 = int_to_ptr.vmem [resolvable:$true] %s975_s8 }
  0x5b   : > { %318 = vmatprep.subr.mxu0 %v309_v5  ;;  %575 = vmatprep.subr.mxu1 %v311_v6  ;;  %v306_v12 = vld [vmem:[%s1678_s7 + $0x1b0] sm:$0xff]  ;;  %v301_v13 = vld [vmem:[%s1678_s7 + $0x188] sm:$0xff]  ;;  %v303_v14 = vld [vmem:[%s1678_s7 + $0x198] sm:$0xff]  ;;  %s1989_s23 = scalar_lea.sflag [#allocation4], %s213_s28  ;;  %s1305_s5 = scalar_lea.vmem %s1981_s8, 16384 }
  0x5c   : > { %319 = vmatpush1.msra.mxu0 %v308_v7  ;;  %576 = vmatpush1.msra.mxu1 %v310_v8  ;;  %v300_v15 = vld [vmem:[%s1678_s7 + $0x180] sm:$0xff]  ;;  %v302_v16 = vld [vmem:[%s1678_s7 + $0x190] sm:$0xff]  ;;  %v297_v17 = vld [vmem:[%s1678_s7 + $0x168] sm:$0xff]  ;;  %p1306_p6 = scmp.ne.s32.totalorder %s1981_s8, %s1305_s5  ;;  %s1463_s15 = smov [#allocation7]  }
  0x5d   : > { %320 = vmatprep.subr.mxu0 %v305_v9  ;;  %577 = vmatprep.subr.mxu1 %v307_v10  ;;  %v299_v18 = vld [vmem:[%s1678_s7 + $0x178] sm:$0xff]  ;;  %v296_v19 = vld [vmem:[%s1678_s7 + $0x160] sm:$0xff]  ;;  %v298_v20 = vld [vmem:[%s1678_s7 + $0x170] sm:$0xff]  ;;  %s1101_s18 = sshll.u32 %s2095_s25, 2 }
  0x5e   : > { %321 = vmatpush1.msra.mxu0 %v304_v11  ;;  %578 = vmatpush1.msra.mxu1 %v306_v12  ;;  %v293_v21 = vld [vmem:[%s1678_s7 + $0x148] sm:$0xff]  ;;  %v295_v22 = vld [vmem:[%s1678_s7 + $0x158] sm:$0xff]  ;;  %v292_v23 = vld [vmem:[%s1678_s7 + $0x140] sm:$0xff]  ;;  %s972_s6 = sadd.s32 %s1108_s29, %s1101_s18 }
  0x5f   : > { %322 = vmatprep.subr.mxu0 %v301_v13  ;;  %579 = vmatprep.subr.mxu1 %v303_v14  ;;  %v294_v24 = vld [vmem:[%s1678_s7 + $0x150] sm:$0xff]  ;;  %v289_v25 = vld [vmem:[%s1678_s7 + $0x128] sm:$0xff]  ;;  %v291_v26 = vld [vmem:[%s1678_s7 + $0x138] sm:$0xff]  ;;  %s1103_s19 = sshll.u32 %s972_s6, 7  ;;  %p2098_p7 = scmp.ne.s32.totalorder %s2096_s30, 0 }
  0x60   : > { %323 = vmatpush1.msra.mxu0 %v300_v15  ;;  %580 = vmatpush1.msra.mxu1 %v302_v16  ;;  %v288_v27 = vld [vmem:[%s1678_s7 + $0x120] sm:$0xff]  ;;  %v290_v28 = vld [vmem:[%s1678_s7 + $0x130] sm:$0xff]  ;;  %v285_v29 = vld [vmem:[%s1678_s7 + $0x108] sm:$0xff] }
  0x61   : > { %324 = vmatprep.subr.mxu0 %v297_v17  ;;  %581 = vmatprep.subr.mxu1 %v299_v18  ;;  %v287_v30 = vld [vmem:[%s1678_s7 + $0x118] sm:$0xff]  ;;  %v284_v31 = vld [vmem:[%s1678_s7 + $0x100] sm:$0xff]  ;;  %v286_v32 = vld [vmem:[%s1678_s7 + $0x110] sm:$0xff]  ;;  %p1307_p11 = pnand %p1306_p6, %p2098_p7 }
  0x62   : > { %325 = vmatpush1.msra.mxu0 %v296_v19  ;;  %582 = vmatpush1.msra.mxu1 %v298_v20  ;;  %v281_v33 = vld [vmem:[%s1678_s7 + $0xe8] sm:$0xff]  ;;  %v283_v34 = vld [vmem:[%s1678_s7 + $0xf8] sm:$0xff]  ;;  %v280_v35 = vld [vmem:[%s1678_s7 + $0xe0] sm:$0xff] }
  0x63   : > { %326 = vmatprep.subr.mxu0 %v293_v21  ;;  %583 = vmatprep.subr.mxu1 %v295_v22  ;;  %v282_v36 = vld [vmem:[%s1678_s7 + $0xf0] sm:$0xff]  ;;  %v277_v37 = vld [vmem:[%s1678_s7 + $0xc8] sm:$0xff]  ;;  %v279_v38 = vld [vmem:[%s1678_s7 + $0xd8] sm:$0xff]  ;;  %p1308_p8 = pneg %p1307_p11 }
  0x64   : > { %327 = vmatpush1.msra.mxu0 %v292_v23  ;;  %584 = vmatpush1.msra.mxu1 %v294_v24  ;;  %v276_v39 = vld [vmem:[%s1678_s7 + $0xc0] sm:$0xff]  ;;  %v278_v40 = vld [vmem:[%s1678_s7 + $0xd0] sm:$0xff]  ;;  %v273_v41 = vld [vmem:[%s1678_s7 + $0xa8] sm:$0xff] }
  0x65   : > { %328 = vmatprep.subr.mxu0 %v289_v25  ;;  %585 = vmatprep.subr.mxu1 %v291_v26  ;;  %v275_v42 = vld [vmem:[%s1678_s7 + $0xb8] sm:$0xff]  ;;  %v272_v43 = vld [vmem:[%s1678_s7 + $0xa0] sm:$0xff]  ;;  %v274_v44 = vld [vmem:[%s1678_s7 + $0xb0] sm:$0xff] }
  0x66   : > { %329 = vmatpush1.msra.mxu0 %v288_v27  ;;  %586 = vmatpush1.msra.mxu1 %v290_v28  ;;  %v269_v45 = vld [vmem:[%s1678_s7 + $0x88] sm:$0xff]  ;;  %v271_v46 = vld [vmem:[%s1678_s7 + $0x98] sm:$0xff]  ;;  %v268_v47 = vld [vmem:[%s1678_s7 + $0x80] sm:$0xff] }
  0x67   : > { %330 = vmatprep.subr.mxu0 %v285_v29  ;;  %587 = vmatprep.subr.mxu1 %v287_v30  ;;  %v270_v48 = vld [vmem:[%s1678_s7 + $0x90] sm:$0xff]  ;;  %v265_v49 = vld [vmem:[%s1678_s7 + $0x68] sm:$0xff]  ;;  %v267_v50 = vld [vmem:[%s1678_s7 + $0x78] sm:$0xff] }
  0x68   : > { %331 = vmatpush1.msra.mxu0 %v284_v31  ;;  %588 = vmatpush1.msra.mxu1 %v286_v32  ;;  %v264_v51 = vld [vmem:[%s1678_s7 + $0x60] sm:$0xff]  ;;  %v266_v52 = vld [vmem:[%s1678_s7 + $0x70] sm:$0xff]  ;;  %v261_v53 = vld [vmem:[%s1678_s7 + $0x48] sm:$0xff] }
  0x69   : > { %332 = vmatprep.subr.mxu0 %v281_v33  ;;  %589 = vmatprep.subr.mxu1 %v283_v34  ;;  %v263_v54 = vld [vmem:[%s1678_s7 + $0x58] sm:$0xff]  ;;  %v260_v55 = vld [vmem:[%s1678_s7 + $0x40] sm:$0xff]  ;;  %v262_v56 = vld [vmem:[%s1678_s7 + $0x50] sm:$0xff] }
  0x6a   : > { %333 = vmatpush1.msra.mxu0 %v280_v35  ;;  %590 = vmatpush1.msra.mxu1 %v282_v36  ;;  %v257_v57 = vld [vmem:[%s1678_s7 + $0x28] sm:$0xff]  ;;  %v259_v58 = vld [vmem:[%s1678_s7 + $0x38] sm:$0xff]  ;;  %v256_v59 = vld [vmem:[%s1678_s7 + $0x20] sm:$0xff] }
  0x6b   : > { %334 = vmatprep.subr.mxu0 %v277_v37  ;;  %591 = vmatprep.subr.mxu1 %v279_v38  ;;  %v258_v60 = vld [vmem:[%s1678_s7 + $0x30] sm:$0xff]  ;;  %v253_v61 = vld [vmem:[%s1678_s7 + $0x8] sm:$0xff]  ;;  %v255_v62 = vld [vmem:[%s1678_s7 + $0x18] sm:$0xff] }
  0x6c   : > { %335 = vmatpush1.msra.mxu0 %v276_v39  ;;  %592 = vmatpush1.msra.mxu1 %v278_v40  ;;  %v252_v63 = vld [vmem:[%s1678_s7] sm:$0xff]  ;;  %v254_v1 = vld [vmem:[%s1678_s7 + $0x10] sm:$0xff]  ;;  %v221_v3 = vld [vmem:[%s1671_s21 + $0x8] sm:$0xff]  ;;  %s1309_s7 = sshll.u32 %s1463_s15, 4  ;;  %s1310_s7 = int_to_ptr.vmem [resolvable:$false] %s1309_s7 }
  0x6d   : > { %336 = vmatprep.subr.mxu0 %v273_v41  ;;  %593 = vmatprep.subr.mxu1 %v275_v42  ;;  %v220_v2 = vld [vmem:[%s1671_s21] sm:$0xff]  ;;  %v222_v4 = vld [vmem:[%s1671_s21 + $0x10] sm:$0xff]  ;;  %v223_v5 = vld [vmem:[%s1671_s21 + $0x18] sm:$0xff]  ;;  %s1311_s24 = scalar_lea.vmem %s1310_s7, 32768  ;;  %p1312_p9 = scmp.lt.s32.totalorder %s1981_s8, %s1310_s7 }
  0x6e   : > { %337 = vmatpush1.msra.mxu0 %v272_v43  ;;  %594 = vmatpush1.msra.mxu1 %v274_v44  ;;  %v224_v6 = vld [vmem:[%s1671_s21 + $0x20] sm:$0xff]  ;;  %v225_v7 = vld [vmem:[%s1671_s21 + $0x28] sm:$0xff]  ;;  %v226_v8 = vld [vmem:[%s1671_s21 + $0x30] sm:$0xff]  ;;  %p1313_p1 = scmp.lt.s32.totalorder %s1311_s24, %s1305_s5 }
  0x6f   : > { %338 = vmatprep.subr.mxu0 %v269_v45  ;;  %595 = vmatprep.subr.mxu1 %v271_v46  ;;  %v227_v9 = vld [vmem:[%s1671_s21 + $0x38] sm:$0xff]  ;;  %v228_v10 = vld [vmem:[%s1671_s21 + $0x40] sm:$0xff]  ;;  %v229_v11 = vld [vmem:[%s1671_s21 + $0x48] sm:$0xff] }
  0x70   : > { %339 = vmatpush1.msra.mxu0 %v268_v47  ;;  %596 = vmatpush1.msra.mxu1 %v270_v48  ;;  %v230_v12 = vld [vmem:[%s1671_s21 + $0x50] sm:$0xff]  ;;  %v231_v13 = vld [vmem:[%s1671_s21 + $0x58] sm:$0xff]  ;;  %v232_v14 = vld [vmem:[%s1671_s21 + $0x60] sm:$0xff]  ;;  %p1314_p2 = por %p1313_p1, %p1312_p9 }
  0x71   : > { %340 = vmatprep.subr.mxu0 %v265_v49  ;;  %597 = vmatprep.subr.mxu1 %v267_v50  ;;  %v233_v15 = vld [vmem:[%s1671_s21 + $0x68] sm:$0xff]  ;;  %v234_v16 = vld [vmem:[%s1671_s21 + $0x70] sm:$0xff]  ;;  %v235_v17 = vld [vmem:[%s1671_s21 + $0x78] sm:$0xff] }
  0x72   : > { %341 = vmatpush1.msra.mxu0 %v264_v51  ;;  %598 = vmatpush1.msra.mxu1 %v266_v52  ;;  %v236_v18 = vld [vmem:[%s1671_s21 + $0x80] sm:$0xff]  ;;  %v237_v19 = vld [vmem:[%s1671_s21 + $0x88] sm:$0xff]  ;;  %v238_v20 = vld [vmem:[%s1671_s21 + $0x90] sm:$0xff]  ;;  %p1315_p4 = pnand %p1314_p2, %p1308_p8 }
  0x73   : > { %342 = vmatprep.subr.mxu0 %v261_v53  ;;  %599 = vmatprep.subr.mxu1 %v263_v54  ;;  %v239_v21 = vld [vmem:[%s1671_s21 + $0x98] sm:$0xff]  ;;  %v240_v22 = vld [vmem:[%s1671_s21 + $0xa0] sm:$0xff]  ;;  %v241_v23 = vld [vmem:[%s1671_s21 + $0xa8] sm:$0xff] }
  0x74   : > { %343 = vmatpush1.msra.mxu0 %v260_v55  ;;  %600 = vmatpush1.msra.mxu1 %v262_v56  ;;  %v242_v24 = vld [vmem:[%s1671_s21 + $0xb0] sm:$0xff]  ;;  %v243_v25 = vld [vmem:[%s1671_s21 + $0xb8] sm:$0xff]  ;;  %v244_v26 = vld [vmem:[%s1671_s21 + $0xc0] sm:$0xff] }
  0x75   : > { %344 = vmatprep.subr.mxu0 %v257_v57  ;;  %601 = vmatprep.subr.mxu1 %v259_v58  ;;  %v245_v27 = vld [vmem:[%s1671_s21 + $0xc8] sm:$0xff]  ;;  %v246_v28 = vld [vmem:[%s1671_s21 + $0xd0] sm:$0xff]  ;;  %v247_v29 = vld [vmem:[%s1671_s21 + $0xd8] sm:$0xff] }
  0x76   : > { %345 = vmatpush1.msra.mxu0 %v256_v59  ;;  %602 = vmatpush1.msra.mxu1 %v258_v60  ;;  %v248_v30 = vld [vmem:[%s1671_s21 + $0xe0] sm:$0xff]  ;;  %v249_v31 = vld [vmem:[%s1671_s21 + $0xe8] sm:$0xff]  ;;  %v250_v32 = vld [vmem:[%s1671_s21 + $0xf0] sm:$0xff] }
  0x77   : > { %346 = vmatprep.subr.mxu0 %v253_v61  ;;  %603 = vmatprep.subr.mxu1 %v255_v62  ;;  %v251_v33 = vld [vmem:[%s1671_s21 + $0xf8] sm:$0xff]  ;;  %s1979_s21 = scalar_lea.hbm %s2097_s4, %s1103_s19 }
  0x78   : > { %347 = vmatpush1.msra.mxu0 %v252_v63  ;;  %604 = vmatpush1.msra.mxu1 %v254_v1 }
  0x79   : > { %381 = vmatmul.mubr.f32.vlgmr.msra.gmra.mxu0 %v220_v2  ;;  %638 = vmatmul.mubr.f32.vlgmr.msra.gmra.mxu1 %v220_v2 }
  0x7a   : > { %386 = vmatprep.mubr.f32.mxu0 %v1462_v0  ;;  %643 = vmatprep.mubr.f32.mxu1 %v1462_v0 }
  0x7d   : > { %387 = vmatmul.mubr.f32.gmra.mxu0 %v221_v3  ;;  %644 = vmatmul.mubr.f32.gmra.mxu1 %v221_v3 }
  0x7e   : > { %392 = vmatprep.mubr.f32.mxu0 %v1462_v0  ;;  %649 = vmatprep.mubr.f32.mxu1 %v1462_v0 }
  0x81   : > { %393 = vmatmul.mubr.f32.gmra.mxu0 %v222_v4  ;;  %650 = vmatmul.mubr.f32.gmra.mxu1 %v222_v4 }
  0x82   : > { %398 = vmatprep.mubr.f32.mxu0 %v1462_v0  ;;  %655 = vmatprep.mubr.f32.mxu1 %v1462_v0 }
  0x85   : > { %399 = vmatmul.mubr.f32.gmra.mxu0 %v223_v5  ;;  %656 = vmatmul.mubr.f32.gmra.mxu1 %v223_v5 }
  0x86   : > { %404 = vmatprep.mubr.f32.mxu0 %v1462_v0  ;;  %661 = vmatprep.mubr.f32.mxu1 %v1462_v0 }
  0x89   : > { %405 = vmatmul.mubr.f32.gmra.mxu0 %v224_v6  ;;  %662 = vmatmul.mubr.f32.gmra.mxu1 %v224_v6 }
  0x8a   : > { %410 = vmatprep.mubr.f32.mxu0 %v1462_v0  ;;  %667 = vmatprep.mubr.f32.mxu1 %v1462_v0 }
  0x8d   : > { %411 = vmatmul.mubr.f32.gmra.mxu0 %v225_v7  ;;  %668 = vmatmul.mubr.f32.gmra.mxu1 %v225_v7 }
  0x8e   : > { %416 = vmatprep.mubr.f32.mxu0 %v1462_v0  ;;  %673 = vmatprep.mubr.f32.mxu1 %v1462_v0 }
  0x91   : > { %417 = vmatmul.mubr.f32.gmra.mxu0 %v226_v8  ;;  %674 = vmatmul.mubr.f32.gmra.mxu1 %v226_v8 }
  0x92   : > { %422 = vmatprep.mubr.f32.mxu0 %v1462_v0  ;;  %679 = vmatprep.mubr.f32.mxu1 %v1462_v0 }
  0x95   : > { %423 = vmatmul.mubr.f32.gmra.mxu0 %v227_v9  ;;  %680 = vmatmul.mubr.f32.gmra.mxu1 %v227_v9 }
  0x96   : > { %428 = vmatprep.mubr.f32.mxu0 %v1462_v0  ;;  %685 = vmatprep.mubr.f32.mxu1 %v1462_v0 }
  0x99   : > { %429 = vmatmul.mubr.f32.gmra.mxu0 %v228_v10  ;;  %686 = vmatmul.mubr.f32.gmra.mxu1 %v228_v10 }
  0x9a   : > { %434 = vmatprep.mubr.f32.mxu0 %v1462_v0  ;;  %691 = vmatprep.mubr.f32.mxu1 %v1462_v0 }
  0x9d   : > { %435 = vmatmul.mubr.f32.gmra.mxu0 %v229_v11  ;;  %692 = vmatmul.mubr.f32.gmra.mxu1 %v229_v11 }
  0x9e   : > { %440 = vmatprep.mubr.f32.mxu0 %v1462_v0  ;;  %697 = vmatprep.mubr.f32.mxu1 %v1462_v0 }
  0xa1   : > { %441 = vmatmul.mubr.f32.gmra.mxu0 %v230_v12  ;;  %698 = vmatmul.mubr.f32.gmra.mxu1 %v230_v12 }
  0xa2   : > { %446 = vmatprep.mubr.f32.mxu0 %v1462_v0  ;;  %703 = vmatprep.mubr.f32.mxu1 %v1462_v0 }
  0xa5   : > { %447 = vmatmul.mubr.f32.gmra.mxu0 %v231_v13  ;;  %704 = vmatmul.mubr.f32.gmra.mxu1 %v231_v13 }
  0xa6   : > { %452 = vmatprep.mubr.f32.mxu0 %v1462_v0  ;;  %709 = vmatprep.mubr.f32.mxu1 %v1462_v0 }
  0xa9   : > { %453 = vmatmul.mubr.f32.gmra.mxu0 %v232_v14  ;;  %710 = vmatmul.mubr.f32.gmra.mxu1 %v232_v14 }
  0xaa   : > { %458 = vmatprep.mubr.f32.mxu0 %v1462_v0  ;;  %715 = vmatprep.mubr.f32.mxu1 %v1462_v0 }
  0xad   : > { %459 = vmatmul.mubr.f32.gmra.mxu0 %v233_v15  ;;  %716 = vmatmul.mubr.f32.gmra.mxu1 %v233_v15 }
  0xae   : > { %464 = vmatprep.mubr.f32.mxu0 %v1462_v0  ;;  %721 = vmatprep.mubr.f32.mxu1 %v1462_v0 }
  0xb1   : > { %465 = vmatmul.mubr.f32.gmra.mxu0 %v234_v16  ;;  %722 = vmatmul.mubr.f32.gmra.mxu1 %v234_v16 }
  0xb2   : > { %470 = vmatprep.mubr.f32.mxu0 %v1462_v0  ;;  %727 = vmatprep.mubr.f32.mxu1 %v1462_v0 }
  0xb5   : > { %471 = vmatmul.mubr.f32.gmra.mxu0 %v235_v17  ;;  %728 = vmatmul.mubr.f32.gmra.mxu1 %v235_v17 }
  0xb6   : > { %476 = vmatprep.mubr.f32.mxu0 %v1462_v0  ;;  %733 = vmatprep.mubr.f32.mxu1 %v1462_v0 }
  0xb9   : > { %477 = vmatmul.mubr.f32.gmra.mxu0 %v236_v18  ;;  %734 = vmatmul.mubr.f32.gmra.mxu1 %v236_v18 }
  0xba   : > { %482 = vmatprep.mubr.f32.mxu0 %v1462_v0  ;;  %739 = vmatprep.mubr.f32.mxu1 %v1462_v0 }
  0xbd   : > { %483 = vmatmul.mubr.f32.gmra.mxu0 %v237_v19  ;;  %740 = vmatmul.mubr.f32.gmra.mxu1 %v237_v19 }
  0xbe   : > { %488 = vmatprep.mubr.f32.mxu0 %v1462_v0  ;;  %745 = vmatprep.mubr.f32.mxu1 %v1462_v0 }
  0xc1   : > { %489 = vmatmul.mubr.f32.gmra.mxu0 %v238_v20  ;;  %746 = vmatmul.mubr.f32.gmra.mxu1 %v238_v20 }
  0xc2   : > { %494 = vmatprep.mubr.f32.mxu0 %v1462_v0  ;;  %751 = vmatprep.mubr.f32.mxu1 %v1462_v0 }
  0xc5   : > { %495 = vmatmul.mubr.f32.gmra.mxu0 %v239_v21  ;;  %752 = vmatmul.mubr.f32.gmra.mxu1 %v239_v21 }
  0xc6   : > { %500 = vmatprep.mubr.f32.mxu0 %v1462_v0  ;;  %757 = vmatprep.mubr.f32.mxu1 %v1462_v0 }
  0xc9   : > { %501 = vmatmul.mubr.f32.gmra.mxu0 %v240_v22  ;;  %758 = vmatmul.mubr.f32.gmra.mxu1 %v240_v22 }
  0xca   : > { %506 = vmatprep.mubr.f32.mxu0 %v1462_v0  ;;  %763 = vmatprep.mubr.f32.mxu1 %v1462_v0 }
  0xcd   : > { %507 = vmatmul.mubr.f32.gmra.mxu0 %v241_v23  ;;  %764 = vmatmul.mubr.f32.gmra.mxu1 %v241_v23 }
  0xce   : > { %512 = vmatprep.mubr.f32.mxu0 %v1462_v0  ;;  %769 = vmatprep.mubr.f32.mxu1 %v1462_v0 }
  0xd1   : > { %513 = vmatmul.mubr.f32.gmra.mxu0 %v242_v24  ;;  %770 = vmatmul.mubr.f32.gmra.mxu1 %v242_v24 }
  0xd2   : > { %518 = vmatprep.mubr.f32.mxu0 %v1462_v0  ;;  %775 = vmatprep.mubr.f32.mxu1 %v1462_v0 }
  0xd5   : > { %519 = vmatmul.mubr.f32.gmra.mxu0 %v243_v25  ;;  %776 = vmatmul.mubr.f32.gmra.mxu1 %v243_v25 }
  0xd6   : > { %524 = vmatprep.mubr.f32.mxu0 %v1462_v0  ;;  %781 = vmatprep.mubr.f32.mxu1 %v1462_v0 }
  0xd9   : > { %525 = vmatmul.mubr.f32.gmra.mxu0 %v244_v26  ;;  %782 = vmatmul.mubr.f32.gmra.mxu1 %v244_v26 }
  0xda   : > { %530 = vmatprep.mubr.f32.mxu0 %v1462_v0  ;;  %787 = vmatprep.mubr.f32.mxu1 %v1462_v0 }
  0xdd   : > { %531 = vmatmul.mubr.f32.gmra.mxu0 %v245_v27  ;;  %788 = vmatmul.mubr.f32.gmra.mxu1 %v245_v27 }
  0xde   : > { %536 = vmatprep.mubr.f32.mxu0 %v1462_v0  ;;  %793 = vmatprep.mubr.f32.mxu1 %v1462_v0 }
  0xe1   : > { %537 = vmatmul.mubr.f32.gmra.mxu0 %v246_v28  ;;  %794 = vmatmul.mubr.f32.gmra.mxu1 %v246_v28 }
  0xe2   : > { %542 = vmatprep.mubr.f32.mxu0 %v1462_v0  ;;  %799 = vmatprep.mubr.f32.mxu1 %v1462_v0 }
  0xe5   : > { %543 = vmatmul.mubr.f32.gmra.mxu0 %v247_v29  ;;  %800 = vmatmul.mubr.f32.gmra.mxu1 %v247_v29 }
  0xe6   : > { %548 = vmatprep.mubr.f32.mxu0 %v1462_v0  ;;  %805 = vmatprep.mubr.f32.mxu1 %v1462_v0 }
  0xe9   : > { %549 = vmatmul.mubr.f32.gmra.mxu0 %v248_v30  ;;  %806 = vmatmul.mubr.f32.gmra.mxu1 %v248_v30 }
  0xea   : > { %554 = vmatprep.mubr.f32.mxu0 %v1462_v0  ;;  %811 = vmatprep.mubr.f32.mxu1 %v1462_v0 }
  0xed   : > { %555 = vmatmul.mubr.f32.gmra.mxu0 %v249_v31  ;;  %812 = vmatmul.mubr.f32.gmra.mxu1 %v249_v31 }
  0xee   : > { %560 = vmatprep.mubr.f32.mxu0 %v1462_v0  ;;  %817 = vmatprep.mubr.f32.mxu1 %v1462_v0 }
  0xf1   : > { %561 = vmatmul.mubr.f32.gmra.mxu0 %v250_v32  ;;  %818 = vmatmul.mubr.f32.gmra.mxu1 %v250_v32 }
  0xf2   : > { %566 = vmatprep.mubr.f32.mxu0 %v1462_v0  ;;  %823 = vmatprep.mubr.f32.mxu1 %v1462_v0 }
  0xf5   : > { %567 = vmatmul.mubr.f32.gmra.mxu0 %v251_v33  ;;  %824 = vmatmul.mubr.f32.gmra.mxu1 %v251_v33 }
 0x139   : > { %v382_v34 = vpop.f32.mrf.mxu0  ;;  %v639_v35 = vpop.f32.mrf.mxu1 }
 0x13a   : > { %830 = vst [vmem:[%s1847_s12] sm:$0xff] %v382_v34  ;;  %832 = vst [vmem:[%s1847_s12 + $0x10] sm:$0xff] %v639_v35 }
 0x13b   : > { %v384_v0 = vpop.f32.mrf.mxu0  ;;  %v641_v36 = vpop.f32.mrf.mxu1 }
 0x13c   : > { %831 = vst [vmem:[%s1847_s12 + $0x8] sm:$0xff] %v384_v0  ;;  %833 = vst [vmem:[%s1847_s12 + $0x18] sm:$0xff] %v641_v36 }
 0x13d   : > { %v388_v37 = vpop.f32.mrf.mxu0  ;;  %v645_v38 = vpop.f32.mrf.mxu1 }
 0x13e   : > { %834 = vst [vmem:[%s1847_s12 + $0x20] sm:$0xff] %v388_v37  ;;  %836 = vst [vmem:[%s1847_s12 + $0x30] sm:$0xff] %v645_v38 }
 0x13f   : > { %v390_v39 = vpop.f32.mrf.mxu0  ;;  %v647_v40 = vpop.f32.mrf.mxu1 }
 0x140   : > { %835 = vst [vmem:[%s1847_s12 + $0x28] sm:$0xff] %v390_v39  ;;  %837 = vst [vmem:[%s1847_s12 + $0x38] sm:$0xff] %v647_v40 }
 0x141   : > { %v394_v41 = vpop.f32.mrf.mxu0  ;;  %v651_v42 = vpop.f32.mrf.mxu1 }
 0x142   : > { %838 = vst [vmem:[%s1847_s12 + $0x40] sm:$0xff] %v394_v41  ;;  %840 = vst [vmem:[%s1847_s12 + $0x50] sm:$0xff] %v651_v42 }
 0x143   : > { %v396_v43 = vpop.f32.mrf.mxu0  ;;  %v653_v44 = vpop.f32.mrf.mxu1 }
 0x144   : > { %839 = vst [vmem:[%s1847_s12 + $0x48] sm:$0xff] %v396_v43  ;;  %841 = vst [vmem:[%s1847_s12 + $0x58] sm:$0xff] %v653_v44 }
 0x145   : > { %v400_v45 = vpop.f32.mrf.mxu0  ;;  %v657_v46 = vpop.f32.mrf.mxu1 }
 0x146   : > { %842 = vst [vmem:[%s1847_s12 + $0x60] sm:$0xff] %v400_v45  ;;  %844 = vst [vmem:[%s1847_s12 + $0x70] sm:$0xff] %v657_v46 }
 0x147   : > { %v402_v47 = vpop.f32.mrf.mxu0  ;;  %v659_v48 = vpop.f32.mrf.mxu1 }
 0x148   : > { %843 = vst [vmem:[%s1847_s12 + $0x68] sm:$0xff] %v402_v47  ;;  %845 = vst [vmem:[%s1847_s12 + $0x78] sm:$0xff] %v659_v48 }
 0x149   : > { %v406_v49 = vpop.f32.mrf.mxu0  ;;  %v663_v50 = vpop.f32.mrf.mxu1 }
 0x14a   : > { %846 = vst [vmem:[%s1847_s12 + $0x80] sm:$0xff] %v406_v49  ;;  %848 = vst [vmem:[%s1847_s12 + $0x90] sm:$0xff] %v663_v50 }
 0x14b   : > { %v408_v51 = vpop.f32.mrf.mxu0  ;;  %v665_v52 = vpop.f32.mrf.mxu1 }
 0x14c   : > { %847 = vst [vmem:[%s1847_s12 + $0x88] sm:$0xff] %v408_v51  ;;  %849 = vst [vmem:[%s1847_s12 + $0x98] sm:$0xff] %v665_v52 }
 0x14d   : > { %v412_v53 = vpop.f32.mrf.mxu0  ;;  %v669_v54 = vpop.f32.mrf.mxu1 }
 0x14e   : > { %850 = vst [vmem:[%s1847_s12 + $0xa0] sm:$0xff] %v412_v53  ;;  %852 = vst [vmem:[%s1847_s12 + $0xb0] sm:$0xff] %v669_v54 }
 0x14f   : > { %v414_v55 = vpop.f32.mrf.mxu0  ;;  %v671_v56 = vpop.f32.mrf.mxu1 }
 0x150   : > { %851 = vst [vmem:[%s1847_s12 + $0xa8] sm:$0xff] %v414_v55  ;;  %853 = vst [vmem:[%s1847_s12 + $0xb8] sm:$0xff] %v671_v56 }
 0x151   : > { %v418_v57 = vpop.f32.mrf.mxu0  ;;  %v675_v58 = vpop.f32.mrf.mxu1 }
 0x152   : > { %854 = vst [vmem:[%s1847_s12 + $0xc0] sm:$0xff] %v418_v57  ;;  %856 = vst [vmem:[%s1847_s12 + $0xd0] sm:$0xff] %v675_v58 }
 0x153   : > { %v420_v59 = vpop.f32.mrf.mxu0  ;;  %v677_v60 = vpop.f32.mrf.mxu1 }
 0x154   : > { %855 = vst [vmem:[%s1847_s12 + $0xc8] sm:$0xff] %v420_v59  ;;  %857 = vst [vmem:[%s1847_s12 + $0xd8] sm:$0xff] %v677_v60 }
 0x155   : > { %v424_v61 = vpop.f32.mrf.mxu0  ;;  %v681_v62 = vpop.f32.mrf.mxu1 }
 0x156   : > { %858 = vst [vmem:[%s1847_s12 + $0xe0] sm:$0xff] %v424_v61  ;;  %860 = vst [vmem:[%s1847_s12 + $0xf0] sm:$0xff] %v681_v62 }
 0x157   : > { %v426_v63 = vpop.f32.mrf.mxu0  ;;  %v683_v1 = vpop.f32.mrf.mxu1 }
 0x158   : > { %859 = vst [vmem:[%s1847_s12 + $0xe8] sm:$0xff] %v426_v63  ;;  %861 = vst [vmem:[%s1847_s12 + $0xf8] sm:$0xff] %v683_v1 }
 0x159   : > { %v430_v2 = vpop.f32.mrf.mxu0  ;;  %v687_v3 = vpop.f32.mrf.mxu1 }
 0x15a   : > { %862 = vst [vmem:[%s1847_s12 + $0x100] sm:$0xff] %v430_v2  ;;  %864 = vst [vmem:[%s1847_s12 + $0x110] sm:$0xff] %v687_v3 }
 0x15b   : > { %v432_v4 = vpop.f32.mrf.mxu0  ;;  %v689_v5 = vpop.f32.mrf.mxu1 }
 0x15c   : > { %863 = vst [vmem:[%s1847_s12 + $0x108] sm:$0xff] %v432_v4  ;;  %865 = vst [vmem:[%s1847_s12 + $0x118] sm:$0xff] %v689_v5 }
 0x15d   : > { %v436_v6 = vpop.f32.mrf.mxu0  ;;  %v693_v7 = vpop.f32.mrf.mxu1 }
 0x15e   : > { %866 = vst [vmem:[%s1847_s12 + $0x120] sm:$0xff] %v436_v6  ;;  %868 = vst [vmem:[%s1847_s12 + $0x130] sm:$0xff] %v693_v7 }
 0x15f   : > { %v438_v8 = vpop.f32.mrf.mxu0  ;;  %v695_v9 = vpop.f32.mrf.mxu1 }
 0x160   : > { %867 = vst [vmem:[%s1847_s12 + $0x128] sm:$0xff] %v438_v8  ;;  %869 = vst [vmem:[%s1847_s12 + $0x138] sm:$0xff] %v695_v9 }
 0x161   : > { %v442_v10 = vpop.f32.mrf.mxu0  ;;  %v699_v11 = vpop.f32.mrf.mxu1 }
 0x162   : > { %870 = vst [vmem:[%s1847_s12 + $0x140] sm:$0xff] %v442_v10  ;;  %872 = vst [vmem:[%s1847_s12 + $0x150] sm:$0xff] %v699_v11 }
 0x163   : > { %v444_v12 = vpop.f32.mrf.mxu0  ;;  %v701_v13 = vpop.f32.mrf.mxu1 }
 0x164   : > { %871 = vst [vmem:[%s1847_s12 + $0x148] sm:$0xff] %v444_v12  ;;  %873 = vst [vmem:[%s1847_s12 + $0x158] sm:$0xff] %v701_v13 }
 0x165   : > { %v448_v14 = vpop.f32.mrf.mxu0  ;;  %v705_v15 = vpop.f32.mrf.mxu1 }
 0x166   : > { %874 = vst [vmem:[%s1847_s12 + $0x160] sm:$0xff] %v448_v14  ;;  %876 = vst [vmem:[%s1847_s12 + $0x170] sm:$0xff] %v705_v15 }
 0x167   : > { %v450_v16 = vpop.f32.mrf.mxu0  ;;  %v707_v17 = vpop.f32.mrf.mxu1 }
 0x168   : > { %875 = vst [vmem:[%s1847_s12 + $0x168] sm:$0xff] %v450_v16  ;;  %877 = vst [vmem:[%s1847_s12 + $0x178] sm:$0xff] %v707_v17 }
 0x169   : > { %v454_v18 = vpop.f32.mrf.mxu0  ;;  %v711_v19 = vpop.f32.mrf.mxu1 }
 0x16a   : > { %878 = vst [vmem:[%s1847_s12 + $0x180] sm:$0xff] %v454_v18  ;;  %880 = vst [vmem:[%s1847_s12 + $0x190] sm:$0xff] %v711_v19 }
 0x16b   : > { %v456_v20 = vpop.f32.mrf.mxu0  ;;  %v713_v21 = vpop.f32.mrf.mxu1 }
 0x16c   : > { %879 = vst [vmem:[%s1847_s12 + $0x188] sm:$0xff] %v456_v20  ;;  %881 = vst [vmem:[%s1847_s12 + $0x198] sm:$0xff] %v713_v21 }
 0x16d   : > { %v460_v22 = vpop.f32.mrf.mxu0  ;;  %v717_v23 = vpop.f32.mrf.mxu1 }
 0x16e   : > { %882 = vst [vmem:[%s1847_s12 + $0x1a0] sm:$0xff] %v460_v22  ;;  %884 = vst [vmem:[%s1847_s12 + $0x1b0] sm:$0xff] %v717_v23 }
 0x16f   : > { %v462_v24 = vpop.f32.mrf.mxu0  ;;  %v719_v25 = vpop.f32.mrf.mxu1 }
 0x170   : > { %883 = vst [vmem:[%s1847_s12 + $0x1a8] sm:$0xff] %v462_v24  ;;  %885 = vst [vmem:[%s1847_s12 + $0x1b8] sm:$0xff] %v719_v25 }
 0x171   : > { %v466_v26 = vpop.f32.mrf.mxu0  ;;  %v723_v27 = vpop.f32.mrf.mxu1 }
 0x172   : > { %886 = vst [vmem:[%s1847_s12 + $0x1c0] sm:$0xff] %v466_v26  ;;  %888 = vst [vmem:[%s1847_s12 + $0x1d0] sm:$0xff] %v723_v27 }
 0x173   : > { %v468_v28 = vpop.f32.mrf.mxu0  ;;  %v725_v29 = vpop.f32.mrf.mxu1 }
 0x174   : > { %887 = vst [vmem:[%s1847_s12 + $0x1c8] sm:$0xff] %v468_v28  ;;  %889 = vst [vmem:[%s1847_s12 + $0x1d8] sm:$0xff] %v725_v29 }
 0x175   : > { %v472_v30 = vpop.f32.mrf.mxu0  ;;  %v729_v31 = vpop.f32.mrf.mxu1 }
 0x176   : > { %890 = vst [vmem:[%s1847_s12 + $0x1e0] sm:$0xff] %v472_v30  ;;  %892 = vst [vmem:[%s1847_s12 + $0x1f0] sm:$0xff] %v729_v31 }
 0x177   : > { %v474_v32 = vpop.f32.mrf.mxu0  ;;  %v731_v33 = vpop.f32.mrf.mxu1 }
 0x178   : > { %891 = vst [vmem:[%s1847_s12 + $0x1e8] sm:$0xff] %v474_v32  ;;  %893 = vst [vmem:[%s1847_s12 + $0x1f8] sm:$0xff] %v731_v33 }
 0x179   : > { %v478_v34 = vpop.f32.mrf.mxu0  ;;  %v735_v35 = vpop.f32.mrf.mxu1 }
 0x17a   : > { %894 = vst [vmem:[%s1847_s12 + $0x200] sm:$0xff] %v478_v34  ;;  %896 = vst [vmem:[%s1847_s12 + $0x210] sm:$0xff] %v735_v35 }
 0x17b   : > { %v480_v0 = vpop.f32.mrf.mxu0  ;;  %v737_v36 = vpop.f32.mrf.mxu1 }
 0x17c   : > { %895 = vst [vmem:[%s1847_s12 + $0x208] sm:$0xff] %v480_v0  ;;  %897 = vst [vmem:[%s1847_s12 + $0x218] sm:$0xff] %v737_v36 }
 0x17d   : > { %v484_v37 = vpop.f32.mrf.mxu0  ;;  %v741_v38 = vpop.f32.mrf.mxu1 }
 0x17e   : > { %898 = vst [vmem:[%s1847_s12 + $0x220] sm:$0xff] %v484_v37  ;;  %900 = vst [vmem:[%s1847_s12 + $0x230] sm:$0xff] %v741_v38 }
 0x17f   : > { %v486_v39 = vpop.f32.mrf.mxu0  ;;  %v743_v40 = vpop.f32.mrf.mxu1 }
 0x180   : > { %899 = vst [vmem:[%s1847_s12 + $0x228] sm:$0xff] %v486_v39  ;;  %901 = vst [vmem:[%s1847_s12 + $0x238] sm:$0xff] %v743_v40 }
 0x181   : > { %v490_v41 = vpop.f32.mrf.mxu0  ;;  %v747_v42 = vpop.f32.mrf.mxu1 }
 0x182   : > { %902 = vst [vmem:[%s1847_s12 + $0x240] sm:$0xff] %v490_v41  ;;  %904 = vst [vmem:[%s1847_s12 + $0x250] sm:$0xff] %v747_v42 }
 0x183   : > { %v492_v43 = vpop.f32.mrf.mxu0  ;;  %v749_v44 = vpop.f32.mrf.mxu1 }
 0x184   : > { %903 = vst [vmem:[%s1847_s12 + $0x248] sm:$0xff] %v492_v43  ;;  %905 = vst [vmem:[%s1847_s12 + $0x258] sm:$0xff] %v749_v44 }
 0x185   : > { %v496_v45 = vpop.f32.mrf.mxu0  ;;  %v753_v46 = vpop.f32.mrf.mxu1 }
 0x186   : > { %906 = vst [vmem:[%s1847_s12 + $0x260] sm:$0xff] %v496_v45  ;;  %908 = vst [vmem:[%s1847_s12 + $0x270] sm:$0xff] %v753_v46 }
 0x187   : > { %v498_v47 = vpop.f32.mrf.mxu0  ;;  %v755_v48 = vpop.f32.mrf.mxu1 }
 0x188   : > { %907 = vst [vmem:[%s1847_s12 + $0x268] sm:$0xff] %v498_v47  ;;  %909 = vst [vmem:[%s1847_s12 + $0x278] sm:$0xff] %v755_v48 }
 0x189   : > { %v502_v49 = vpop.f32.mrf.mxu0  ;;  %v759_v50 = vpop.f32.mrf.mxu1 }
 0x18a   : > { %910 = vst [vmem:[%s1847_s12 + $0x280] sm:$0xff] %v502_v49  ;;  %912 = vst [vmem:[%s1847_s12 + $0x290] sm:$0xff] %v759_v50 }
 0x18b   : > { %v504_v51 = vpop.f32.mrf.mxu0  ;;  %v761_v52 = vpop.f32.mrf.mxu1 }
 0x18c   : > { %911 = vst [vmem:[%s1847_s12 + $0x288] sm:$0xff] %v504_v51  ;;  %913 = vst [vmem:[%s1847_s12 + $0x298] sm:$0xff] %v761_v52 }
 0x18d   : > { %v508_v53 = vpop.f32.mrf.mxu0  ;;  %v765_v54 = vpop.f32.mrf.mxu1 }
 0x18e   : > { %914 = vst [vmem:[%s1847_s12 + $0x2a0] sm:$0xff] %v508_v53  ;;  %916 = vst [vmem:[%s1847_s12 + $0x2b0] sm:$0xff] %v765_v54 }
 0x18f   : > { %v510_v55 = vpop.f32.mrf.mxu0  ;;  %v767_v56 = vpop.f32.mrf.mxu1 }
 0x190   : > { %915 = vst [vmem:[%s1847_s12 + $0x2a8] sm:$0xff] %v510_v55  ;;  %917 = vst [vmem:[%s1847_s12 + $0x2b8] sm:$0xff] %v767_v56 }
 0x191   : > { %v514_v57 = vpop.f32.mrf.mxu0  ;;  %v771_v58 = vpop.f32.mrf.mxu1 }
 0x192   : > { %918 = vst [vmem:[%s1847_s12 + $0x2c0] sm:$0xff] %v514_v57  ;;  %920 = vst [vmem:[%s1847_s12 + $0x2d0] sm:$0xff] %v771_v58 }
 0x193   : > { %v516_v59 = vpop.f32.mrf.mxu0  ;;  %v773_v60 = vpop.f32.mrf.mxu1 }
 0x194   : > { %919 = vst [vmem:[%s1847_s12 + $0x2c8] sm:$0xff] %v516_v59  ;;  %921 = vst [vmem:[%s1847_s12 + $0x2d8] sm:$0xff] %v773_v60 }
 0x195   : > { %v520_v61 = vpop.f32.mrf.mxu0  ;;  %v777_v62 = vpop.f32.mrf.mxu1 }
 0x196   : > { %922 = vst [vmem:[%s1847_s12 + $0x2e0] sm:$0xff] %v520_v61  ;;  %924 = vst [vmem:[%s1847_s12 + $0x2f0] sm:$0xff] %v777_v62 }
 0x197   : > { %v522_v63 = vpop.f32.mrf.mxu0  ;;  %v779_v1 = vpop.f32.mrf.mxu1 }
 0x198   : > { %923 = vst [vmem:[%s1847_s12 + $0x2e8] sm:$0xff] %v522_v63  ;;  %925 = vst [vmem:[%s1847_s12 + $0x2f8] sm:$0xff] %v779_v1 }
 0x199   : > { %v526_v2 = vpop.f32.mrf.mxu0  ;;  %v783_v3 = vpop.f32.mrf.mxu1 }
 0x19a   : > { %926 = vst [vmem:[%s1847_s12 + $0x300] sm:$0xff] %v526_v2  ;;  %928 = vst [vmem:[%s1847_s12 + $0x310] sm:$0xff] %v783_v3 }
 0x19b   : > { %v528_v4 = vpop.f32.mrf.mxu0  ;;  %v785_v5 = vpop.f32.mrf.mxu1 }
 0x19c   : > { %927 = vst [vmem:[%s1847_s12 + $0x308] sm:$0xff] %v528_v4  ;;  %929 = vst [vmem:[%s1847_s12 + $0x318] sm:$0xff] %v785_v5 }
 0x19d   : > { %v532_v6 = vpop.f32.mrf.mxu0  ;;  %v789_v7 = vpop.f32.mrf.mxu1 }
 0x19e   : > { %930 = vst [vmem:[%s1847_s12 + $0x320] sm:$0xff] %v532_v6  ;;  %932 = vst [vmem:[%s1847_s12 + $0x330] sm:$0xff] %v789_v7 }
 0x19f   : > { %v534_v8 = vpop.f32.mrf.mxu0  ;;  %v791_v9 = vpop.f32.mrf.mxu1 }
 0x1a0   : > { %931 = vst [vmem:[%s1847_s12 + $0x328] sm:$0xff] %v534_v8  ;;  %933 = vst [vmem:[%s1847_s12 + $0x338] sm:$0xff] %v791_v9 }
 0x1a1   : > { %v538_v10 = vpop.f32.mrf.mxu0  ;;  %v795_v11 = vpop.f32.mrf.mxu1 }
 0x1a2   : > { %934 = vst [vmem:[%s1847_s12 + $0x340] sm:$0xff] %v538_v10  ;;  %936 = vst [vmem:[%s1847_s12 + $0x350] sm:$0xff] %v795_v11 }
 0x1a3   : > { %v540_v12 = vpop.f32.mrf.mxu0  ;;  %v797_v13 = vpop.f32.mrf.mxu1 }
 0x1a4   : > { %935 = vst [vmem:[%s1847_s12 + $0x348] sm:$0xff] %v540_v12  ;;  %937 = vst [vmem:[%s1847_s12 + $0x358] sm:$0xff] %v797_v13 }
 0x1a5   : > { %v544_v14 = vpop.f32.mrf.mxu0  ;;  %v801_v15 = vpop.f32.mrf.mxu1 }
 0x1a6   : > { %938 = vst [vmem:[%s1847_s12 + $0x360] sm:$0xff] %v544_v14  ;;  %940 = vst [vmem:[%s1847_s12 + $0x370] sm:$0xff] %v801_v15 }
 0x1a7   : > { %v546_v16 = vpop.f32.mrf.mxu0  ;;  %v803_v17 = vpop.f32.mrf.mxu1 }
 0x1a8   : > { %939 = vst [vmem:[%s1847_s12 + $0x368] sm:$0xff] %v546_v16  ;;  %941 = vst [vmem:[%s1847_s12 + $0x378] sm:$0xff] %v803_v17 }
 0x1a9   : > { %v550_v18 = vpop.f32.mrf.mxu0  ;;  %v807_v19 = vpop.f32.mrf.mxu1 }
 0x1aa   : > { %942 = vst [vmem:[%s1847_s12 + $0x380] sm:$0xff] %v550_v18  ;;  %944 = vst [vmem:[%s1847_s12 + $0x390] sm:$0xff] %v807_v19 }
 0x1ab   : > { %v552_v20 = vpop.f32.mrf.mxu0  ;;  %v809_v21 = vpop.f32.mrf.mxu1 }
 0x1ac   : > { %943 = vst [vmem:[%s1847_s12 + $0x388] sm:$0xff] %v552_v20  ;;  %945 = vst [vmem:[%s1847_s12 + $0x398] sm:$0xff] %v809_v21 }
 0x1ad   : > { %v556_v22 = vpop.f32.mrf.mxu0  ;;  %v813_v23 = vpop.f32.mrf.mxu1 }
 0x1ae   : > { %946 = vst [vmem:[%s1847_s12 + $0x3a0] sm:$0xff] %v556_v22  ;;  %948 = vst [vmem:[%s1847_s12 + $0x3b0] sm:$0xff] %v813_v23 }
 0x1af   : > { %v558_v24 = vpop.f32.mrf.mxu0  ;;  %v815_v25 = vpop.f32.mrf.mxu1 }
 0x1b0   : > { %947 = vst [vmem:[%s1847_s12 + $0x3a8] sm:$0xff] %v558_v24  ;;  %949 = vst [vmem:[%s1847_s12 + $0x3b8] sm:$0xff] %v815_v25 }
 0x1b1   : > { %v562_v26 = vpop.f32.mrf.mxu0  ;;  %v819_v27 = vpop.f32.mrf.mxu1 }
 0x1b2   : > { %950 = vst [vmem:[%s1847_s12 + $0x3c0] sm:$0xff] %v562_v26  ;;  %952 = vst [vmem:[%s1847_s12 + $0x3d0] sm:$0xff] %v819_v27 }
 0x1b3   : > { %v564_v28 = vpop.f32.mrf.mxu0  ;;  %v821_v29 = vpop.f32.mrf.mxu1 }
 0x1b4   : > { %951 = vst [vmem:[%s1847_s12 + $0x3c8] sm:$0xff] %v564_v28  ;;  %953 = vst [vmem:[%s1847_s12 + $0x3d8] sm:$0xff] %v821_v29 }
 0x1b5   : > { %v568_v30 = vpop.f32.mrf.mxu0  ;;  %v825_v31 = vpop.f32.mrf.mxu1 }
 0x1b6   : > { %954 = vst [vmem:[%s1847_s12 + $0x3e0] sm:$0xff] %v568_v30  ;;  %956 = vst [vmem:[%s1847_s12 + $0x3f0] sm:$0xff] %v825_v31 }
 0x1b7   : > { %v570_v32 = vpop.f32.mrf.mxu0  ;;  %v827_v33 = vpop.f32.mrf.mxu1 }
 0x1b8   : > { %955 = vst [vmem:[%s1847_s12 + $0x3e8] sm:$0xff] %v570_v32  ;;  %957 = vst [vmem:[%s1847_s12 + $0x3f8] sm:$0xff] %v827_v33 }
 0x1b9   : > { %1318 = shalt.err (!%p1315_p4)
}
 0x1ba   : > { %s1319_s28 = scalar_lea.hbm %s1979_s21, 16384  ;;  %s1323_s29 = scalar_lea.hbm %s2097_s4, 196608 }
 0x1bb   : > { %p1320_p5 = scmp.ne.s32.totalorder %s1979_s21, %s1319_s28  ;;  %p1324_p3 = scmp.lt.s32.totalorder %s1979_s21, %s2097_s4 }
 0x1bc   : > { %p1325_p13 = scmp.lt.s32.totalorder %s1323_s29, %s1319_s28 }
 0x1bd   : > { %p1321_p10 = pnand %p1320_p5, %p2098_p7 }
 0x1be   : > { %p1326_p0 = por %p1325_p13, %p1324_p3 }
 0x1bf   : > { %p1322_p12 = pneg %p1321_p10 }
 0x1c1   : > { %p1327_p6 = pnand %p1326_p0, %p1322_p12 }
 0x1c3   : > { %1330 = shalt.err (!%p1327_p6)
}
 0x1c4   : > { %s1464_s19 = smov 512   ;;  %s1465_s26 = smov 1536  }
 0x1c5   : > { %s1466_s3 = smov 32  }
 0x1c6   : > { %1113 = dma.vmem_to_hbm [thread:$0]  (%p2098_p7), %s1981_s8, 16384, %s1979_s21, %s1989_s23, %s1464_s19, %s1465_s26, %s1466_s3  }
 0x1c7 PF: > { %p1127_p11 = scmp.ge.s32.totalorder %s1453_s22, 2  ;;  %s990_s5 = sand.u32 1, %s1401_s9  }
 0x1c8   : > { %p2099_p8 = scmp.ne.s32.totalorder %s2093_s27, 0  ;;  %s991_s15 = scalar_lea.sflag [#allocation4], %s990_s5 }
 0x1ca   : > { %p1123_p9 = pnand %p1127_p11, %p2099_p8 }
 0x1cc   : > { %p1124_p1 = pneg %p1123_p9 }
 0x1ce   : > { %1396 = dma.done.wait (%p1124_p1), %s991_s15, 16384  }
 0x1cf   : > { %1398 = vsyncadd (%p1124_p1), %s991_s15, 4294950912  ;;  %s21_s22 = sadd.s32 1, %s1453_s22   ;;  %s2101_s8 = sld [smem:[#allocation15_spill]] }
 0x1d0   : > { %p2017_p2 = scmp.ge.s32.totalorder %s21_s22, 14   ;;  %s2102_s19 = sld [smem:[#allocation12_spill]] }
 0x1d1   : > { %s2103_s27 = sld [smem:[#allocation13_spill]]  ;;  %s2105_s9 = smov %s1405_s10 }
 0x1d2   : > { %s2104_s21 = sld [smem:[#allocation14_spill]]  ;;  %s2106_s10 = smov %s1409_s11 }
 0x1d3   : > { %s2107_s11 = smov %s1645_s0  ;;  %s2108_s12 = smov %s1417_s13 }
 0x1d4   : > { %s2109_s13 = smov %s1421_s14  ;;  %s2111_s15 = smov %s1429_s16 }
 0x1d5   : > { %s2110_s14 = smov %s2101_s8  ;;  %s2112_s16 = smov %s1433_s17 }
 0x1d6   : > { %s2113_s17 = smov %s1642_s2  ;;  %s2114_s18 = smov %s1445_s20 }
 0x1d7   : > { %s2115_s20 = smov %s2103_s27  ;;  %20 = sbr.rel (!%p2017_p2) target bundleno = 15 (0xf), region = 86 }
 0x1dc   :  { %996 = vsyncpa [#allocation3], 1 }
 0x1dd   :  { %998 = vsyncpa [#allocation3 + $0x1], 1 }
 0x1de   :  { %999 = vsyncpa [#allocation6], 1 }
 0x1df   :  { %1001 = vsyncpa [#allocation6 + $0x1], 1 }
 0x1e0   :  { %1002 = vsyncpa [#allocation4], 1 }
 0x1e1   :  { %1004 = vsyncpa [#allocation4 + $0x1], 1 }

</bundles_post_ra>
